<compile_context>
chip_gen: v7x
topology: tpu7x:2x2x1
jax: 0.10.0
libtpu: 0.0.40
codegen_flags: <defaults>
</compile_context>

<pallas_src>
import jax
import jax.numpy as jnp
from jax.experimental import pallas as pl
from jax.experimental.pallas import tpu as pltpu


def _round_up(x, m):
    return (x + m - 1) // m * m


def _leaky_relu(x, alpha=0.2):
    return jnp.where(x > 0, x, alpha * x)


def disc_mlp_kernel(x_ref, w1_ref, embb_ref, b1_ref,
                    w2_ref, b2_ref, w3_ref, b3_ref, w4_ref, b4_ref,
                    o_ref, acc_ref):
    """One (batch-tile, k-tile) grid step of the discriminator MLP.

    grid = (num_batch_tiles, num_k_tiles); k is the layer-1 reduction over the
    flattened image features (innermost, "arbitrary").  acc_ref is an f32 VMEM
    accumulator for the layer-1 pre-activation, resident across k.
    """
    k = pl.program_id(1)

    # Layer-1 init: per-row label-embedding contribution (precomputed in the
    # wrapper as emb @ w1_emb, gathered per label) + layer-1 bias.
    @pl.when(k == 0)
    def _():
        acc_ref[...] = embb_ref[...] + b1_ref[...]

    # Layer-1 partial matmul over this K tile (bf16 in, f32 accumulate).
    acc_ref[...] += jnp.dot(x_ref[...], w1_ref[...],
                            preferred_element_type=jnp.float32)

    # On the last K tile finish layer 1 and run layers 2-4 (all 128-lane padded).
    @pl.when(k == pl.num_programs(1) - 1)
    def _():
        h = _leaky_relu(acc_ref[...])
        # TODO(synk): Dropout(0.3) is identity here (inference semantics); a
        # training-mode mask via pltpu.prng_random_bits could be added.

        h = jnp.dot(h.astype(w2_ref.dtype), w2_ref[...],
                    preferred_element_type=jnp.float32) + b2_ref[...]
        h = _leaky_relu(h)

        h = jnp.dot(h.astype(w3_ref.dtype), w3_ref[...],
                    preferred_element_type=jnp.float32) + b3_ref[...]
        h = _leaky_relu(h)

        out = jnp.dot(h.astype(w4_ref.dtype), w4_ref[...],
                      preferred_element_type=jnp.float32) + b4_ref[...]
        o_ref[...] = out.astype(o_ref.dtype)


def discriminator_forward(x, labels, params, *, tb=128, tk=512,
                          compute_dtype=jnp.bfloat16):
    """Forward pass matching Discriminator.forward.

    x:      (B, C, H, W) float32
    labels: (B,)         int32
    returns (B,) float32  (matches out.squeeze() for B > 1)

    tb: batch tile (multiple of 8; 128 suits v5e, 256 suits v6e/v7x MXU rows).
    tk: layer-1 K tile over the flattened image features (multiple of 128).
    """
    emb = params["label_emb"]            # (class_num, class_num)
    w1, b1 = params["w1"], params["b1"]  # (input_dim + class_num, H1), (1, H1)
    w2, b2 = params["w2"], params["b2"]
    w3, b3 = params["w3"], params["b3"]
    w4, b4 = params["w4"], params["b4"]

    B = x.shape[0]
    D_img = x.shape[1] * x.shape[2] * x.shape[3]
    H1, H2, H3 = w1.shape[1], w2.shape[1], w3.shape[1]

    LANE = 128
    cd = compute_dtype

    # ---- alignment / tiling ------------------------------------------------
    tk_eff = min(tk, _round_up(D_img, LANE))      # 128-aligned K tile
    D_pad = _round_up(D_img, tk_eff)
    num_k = D_pad // tk_eff

    tb_eff = min(tb, _round_up(B, 8))             # sublane-aligned batch tile
    B_pad = _round_up(B, tb_eff)
    num_b = B_pad // tb_eff

    H1p = _round_up(H1, LANE)
    H2p = _round_up(H2, LANE)
    H3p = _round_up(H3, LANE)
    OUTp = LANE                                   # lane-dense output block

    # ---- split / zero-pad / cast parameters (zero padding is exact) --------
    w1_img = w1[:D_img]                           # image columns of layer 1
    w1_emb = w1[D_img:]                           # label-embedding columns

    w1_p = jnp.pad(w1_img, ((0, D_pad - D_img), (0, H1p - H1))).astype(cd)
    b1_p = jnp.pad(b1, ((0, 0), (0, H1p - H1)))
    w2_p = jnp.pad(w2, ((0, H1p - H1), (0, H2p - H2))).astype(cd)
    b2_p = jnp.pad(b2, ((0, 0), (0, H2p - H2)))
    w3_p = jnp.pad(w3, ((0, H2p - H2), (0, H3p - H3))).astype(cd)
    b3_p = jnp.pad(b3, ((0, 0), (0, H3p - H3)))
    w4_p = jnp.pad(w4, ((0, H3p - H3), (0, OUTp - w4.shape[1]))).astype(cd)
    b4_p = jnp.pad(b4, ((0, 0), (0, OUTp - b4.shape[1])))

    # Label-embedding contribution to layer 1: precompute emb @ w1_emb once
    # (class_num x H1), gather per-label rows -> per-row f32 bias for the kernel.
    emb_proj = jnp.dot(emb.astype(cd), w1_emb.astype(cd),
                       preferred_element_type=jnp.float32)
    emb_proj = jnp.pad(emb_proj, ((0, 0), (0, H1p - H1)))
    emb_bias = jnp.take(emb_proj, labels, axis=0)            # (B, H1p) f32
    emb_bias = jnp.pad(emb_bias, ((0, B_pad - B), (0, 0)))

    # Flattened, padded, cast activations.
    x_flat = x.reshape(B, D_img)
    x_p = jnp.pad(x_flat, ((0, B_pad - B), (0, D_pad - D_img))).astype(cd)

    flops = 2 * B_pad * (D_pad * H1p + H1p * H2p + H2p * H3p + H3p * OUTp)
    bytes_accessed = (x_p.nbytes + w1_p.nbytes + emb_bias.nbytes + b1_p.nbytes
                      + w2_p.nbytes + b2_p.nbytes + w3_p.nbytes + b3_p.nbytes
                      + w4_p.nbytes + b4_p.nbytes + B_pad * OUTp * 4)

    out_pad = pl.pallas_call(
        disc_mlp_kernel,
        out_shape=jax.ShapeDtypeStruct((B_pad, OUTp), jnp.float32),
        grid_spec=pltpu.PrefetchScalarGridSpec(
            num_scalar_prefetch=0,
            grid=(num_b, num_k),
            in_specs=[
                pl.BlockSpec((tb_eff, tk_eff), lambda i, k: (i, k)),   # x tile
                pl.BlockSpec((tk_eff, H1p), lambda i, k: (k, 0)),      # w1_img tile
                pl.BlockSpec((tb_eff, H1p), lambda i, k: (i, 0)),      # emb bias
                pl.BlockSpec((1, H1p), lambda i, k: (0, 0)),           # b1
                pl.BlockSpec((H1p, H2p), lambda i, k: (0, 0)),         # w2 (resident)
                pl.BlockSpec((1, H2p), lambda i, k: (0, 0)),           # b2
                pl.BlockSpec((H2p, H3p), lambda i, k: (0, 0)),         # w3 (resident)
                pl.BlockSpec((1, H3p), lambda i, k: (0, 0)),           # b3
                pl.BlockSpec((H3p, OUTp), lambda i, k: (0, 0)),        # w4 (resident)
                pl.BlockSpec((1, OUTp), lambda i, k: (0, 0)),          # b4
            ],
            out_specs=pl.BlockSpec((tb_eff, OUTp), lambda i, k: (i, 0)),
            scratch_shapes=[pltpu.VMEM((tb_eff, H1p), jnp.float32)],
        ),
        compiler_params=pltpu.CompilerParams(
            dimension_semantics=("parallel", "arbitrary"),
            vmem_limit_bytes=64 * 1024 * 1024,
        ),
        cost_estimate=pl.CostEstimate(flops=flops, transcendentals=0,
                                      bytes_accessed=bytes_accessed),
    )(x_p, w1_p, emb_bias, b1_p, w2_p, b2_p, w3_p, b3_p, w4_p, b4_p)

    # Column 0 holds the real logit; rows B..B_pad are batch padding.
    out = out_pad[:B, 0]
    # TODO(synk): torch's out.squeeze() returns a 0-d tensor for B == 1; this
    # wrapper always returns shape (B,).
    return out


def init_params(key, input_dim, class_num, layer_sizes):
    """Deterministic synthetic parameter init (shapes match the PyTorch module,
    with Linear weights stored transposed: (in_features, out_features))."""
    ks = jax.random.split(key, 9)
    H1, H2, H3 = layer_sizes
    d0 = input_dim + class_num

    def lin(kw, fan_in, fan_out):
        scale = 1.0 / jnp.sqrt(fan_in)
        return jax.random.uniform(kw, (fan_in, fan_out), jnp.float32, -scale, scale)

    return {
        "label_emb": jax.random.normal(ks[0], (class_num, class_num), jnp.float32),
        "w1": lin(ks[1], d0, H1),
        "b1": jax.random.uniform(ks[2], (1, H1), jnp.float32, -0.05, 0.05),
        "w2": lin(ks[3], H1, H2),
        "b2": jax.random.uniform(ks[4], (1, H2), jnp.float32, -0.05, 0.05),
        "w3": lin(ks[5], H2, H3),
        "b3": jax.random.uniform(ks[6], (1, H3), jnp.float32, -0.05, 0.05),
        "w4": lin(ks[7], H3, 1),
        "b4": jax.random.uniform(ks[8], (1, 1), jnp.float32, -0.05, 0.05),
    }


if __name__ == "__main__":
    key = jax.random.PRNGKey(0)
    k_x, k_lbl, k_p = jax.random.split(key, 3)

    # Small shapes consistent with the module: img_shape=(1,16,16), 4 classes,
    # discriminator_layer_size=[128, 64, 32], batch=2.
    B = 2
    img_shape = (1, 16, 16)
    class_num = 4
    layer_sizes = (128, 64, 32)
    input_dim = img_shape[0] * img_shape[1] * img_shape[2]

    x = jax.random.normal(k_x, (B,) + img_shape, jnp.float32)
    labels = jax.random.randint(k_lbl, (B,), 0, class_num, jnp.int32)
    params = init_params(k_p, input_dim, class_num, layer_sizes)

    out = discriminator_forward(x, labels, params)
    out = jax.block_until_ready(out)

    # Pure-JAX reference of the original concat-form forward, using the same
    # bf16 inputs / f32 accumulation as the kernel.
    cd = jnp.bfloat16
    x_flat = x.reshape(B, input_dim).astype(cd)
    c = params["label_emb"].astype(cd)[labels]
    h = jnp.dot(jnp.concatenate([x_flat, c], axis=1), params["w1"].astype(cd),
                preferred_element_type=jnp.float32) + params["b1"]
    h = jnp.where(h > 0, h, 0.2 * h)
    for wk, bk in (("w2", "b2"), ("w3", "b3")):
        h = jnp.dot(h.astype(cd), params[wk].astype(cd),
                    preferred_element_type=jnp.float32) + params[bk]
        h = jnp.where(h > 0, h, 0.2 * h)
    ref = jnp.dot(h.astype(cd), params["w4"].astype(cd),
                  preferred_element_type=jnp.float32) + params["b4"]
    ref = jnp.squeeze(ref, axis=-1)

    assert out.shape == (B,)
    assert jnp.allclose(out, ref, atol=5e-3, rtol=1e-2), (out, ref)
    print("KERNEL_OK")
</pallas_src>

<mosaic_0001>
module attributes {stable_mosaic.version = 11 : i64} {
  func.func @disc_mlp_kernel(%arg0: i32, %arg1: i32, %arg2: memref<8x256xbf16, #tpu.memory_space<vmem>>, %arg3: memref<256x128xbf16, #tpu.memory_space<vmem>>, %arg4: memref<8x128xf32, #tpu.memory_space<vmem>>, %arg5: memref<1x128xf32, #tpu.memory_space<vmem>>, %arg6: memref<128x128xbf16, #tpu.memory_space<vmem>>, %arg7: memref<1x128xf32, #tpu.memory_space<vmem>>, %arg8: memref<128x128xbf16, #tpu.memory_space<vmem>>, %arg9: memref<1x128xf32, #tpu.memory_space<vmem>>, %arg10: memref<128x128xbf16, #tpu.memory_space<vmem>>, %arg11: memref<1x128xf32, #tpu.memory_space<vmem>>, %arg12: memref<8x128xf32, #tpu.memory_space<vmem>>, %arg13: memref<8x128xf32, #tpu.memory_space<vmem>>) attributes {dimension_semantics = [#tpu.dimension_semantics<parallel>, #tpu.dimension_semantics<arbitrary>], iteration_bounds = array<i64: 1, 1>, scalar_prefetch = 0 : i64, scratch_operands = 1 : i64, tpu.core_type = #tpu.core_type<tc>, window_params = [{transform_indices = @transform_0, window_bounds = array<i64: 8, 256>}, {transform_indices = @transform_1, window_bounds = array<i64: 256, 128>}, {transform_indices = @transform_2, window_bounds = array<i64: 8, 128>}, {pipeline_mode = #tpu.pipeline_mode<synchronous>, transform_indices = @transform_3, window_bounds = array<i64: 1, 128>}, {pipeline_mode = #tpu.pipeline_mode<synchronous>, transform_indices = @transform_4, window_bounds = array<i64: 128, 128>}, {pipeline_mode = #tpu.pipeline_mode<synchronous>, transform_indices = @transform_5, window_bounds = array<i64: 1, 128>}, {pipeline_mode = #tpu.pipeline_mode<synchronous>, transform_indices = @transform_6, window_bounds = array<i64: 128, 128>}, {pipeline_mode = #tpu.pipeline_mode<synchronous>, transform_indices = @transform_7, window_bounds = array<i64: 1, 128>}, {pipeline_mode = #tpu.pipeline_mode<synchronous>, transform_indices = @transform_8, window_bounds = array<i64: 128, 128>}, {pipeline_mode = #tpu.pipeline_mode<synchronous>, transform_indices = @transform_9, window_bounds = array<i64: 1, 128>}, {transform_indices = @transform_10, window_bounds = array<i64: 8, 128>}]} {
    %c0_i32 = arith.constant 0 : i32
    %0 = arith.cmpi eq, %arg1, %c0_i32 : i32
    %1 = arith.extui %0 : i1 to i32
    %c0_i32_0 = arith.constant 0 : i32
    %2 = arith.cmpi ne, %1, %c0_i32_0 : i32
    scf.if %2 {
      %c0_10 = arith.constant 0 : index
      %c0_11 = arith.constant 0 : index
      %12 = vector.load %arg4[%c0_10, %c0_11] : memref<8x128xf32, #tpu.memory_space<vmem>>, vector<8x128xf32>
      %c0_12 = arith.constant 0 : index
      %c0_13 = arith.constant 0 : index
      %13 = vector.load %arg5[%c0_12, %c0_13] : memref<1x128xf32, #tpu.memory_space<vmem>>, vector<1x128xf32>
      %14 = vector.broadcast %13 : vector<1x128xf32> to vector<8x128xf32>
      %15 = arith.addf %12, %14 : vector<8x128xf32>
      %c0_14 = arith.constant 0 : index
      %c0_15 = arith.constant 0 : index
      %16 = vector.load %arg13[%c0_14, %c0_15] : memref<8x128xf32, #tpu.memory_space<vmem>>, vector<8x128xf32>
      tpu.vector_store %arg13[%c0_14, %c0_15], %15 {strides = array<i32>} : memref<8x128xf32, #tpu.memory_space<vmem>>, vector<8x128xf32>,
    } else {
    }
    %c0 = arith.constant 0 : index
    %c0_1 = arith.constant 0 : index
    %3 = vector.load %arg13[%c0, %c0_1] : memref<8x128xf32, #tpu.memory_space<vmem>>, vector<8x128xf32>
    %c0_2 = arith.constant 0 : index
    %c0_3 = arith.constant 0 : index
    %4 = vector.load %arg2[%c0_2, %c0_3] : memref<8x256xbf16, #tpu.memory_space<vmem>>, vector<8x256xbf16>
    %c0_4 = arith.constant 0 : index
    %c0_5 = arith.constant 0 : index
    %5 = vector.load %arg3[%c0_4, %c0_5] : memref<256x128xbf16, #tpu.memory_space<vmem>>, vector<256x128xbf16>
    %cst = arith.constant dense<0.000000e+00> : vector<8x128xf32>
    %6 = tpu.matmul %4, %5, %cst {dimension_numbers = #tpu.dot_dimension_numbers<[1], [0], [0], [1], [0, 0, 1, 1], [], []>} : vector<8x256xbf16>, vector<256x128xbf16>, vector<8x128xf32> -> vector<8x128xf32>
    %7 = arith.addf %3, %6 : vector<8x128xf32>
    %c0_6 = arith.constant 0 : index
    %c0_7 = arith.constant 0 : index
    %8 = vector.load %arg13[%c0_6, %c0_7] : memref<8x128xf32, #tpu.memory_space<vmem>>, vector<8x128xf32>
    tpu.vector_store %arg13[%c0_6, %c0_7], %7 {strides = array<i32>} : memref<8x128xf32, #tpu.memory_space<vmem>>, vector<8x128xf32>,
    %c0_i32_8 = arith.constant 0 : i32
    %9 = arith.cmpi eq, %arg1, %c0_i32_8 : i32
    %10 = arith.extui %9 : i1 to i32
    %c0_i32_9 = arith.constant 0 : i32
    %11 = arith.cmpi ne, %10, %c0_i32_9 : i32
    scf.if %11 {
      %c0_10 = arith.constant 0 : index
      %c0_11 = arith.constant 0 : index
      %12 = vector.load %arg13[%c0_10, %c0_11] : memref<8x128xf32, #tpu.memory_space<vmem>>, vector<8x128xf32>
      %cst_12 = arith.constant 0.000000e+00 : f32
      %13 = vector.broadcast %cst_12 : f32 to vector<8x128xf32>
      %14 = arith.cmpf ogt, %12, %13 : vector<8x128xf32>
      %cst_13 = arith.constant 2.000000e-01 : f32
      %15 = vector.broadcast %cst_13 : f32 to vector<8x128xf32>
      %16 = arith.mulf %15, %12 : vector<8x128xf32>
      %17 = arith.select %14, %12, %16 : vector<8x128xi1>, vector<8x128xf32>
      %18 = arith.truncf %17 : vector<8x128xf32> to vector<8x128xbf16>
      %c0_14 = arith.constant 0 : index
      %c0_15 = arith.constant 0 : index
      %19 = vector.load %arg6[%c0_14, %c0_15] : memref<128x128xbf16, #tpu.memory_space<vmem>>, vector<128x128xbf16>
      %cst_16 = arith.constant dense<0.000000e+00> : vector<8x128xf32>
      %20 = tpu.matmul %18, %19, %cst_16 {dimension_numbers = #tpu.dot_dimension_numbers<[1], [0], [0], [1], [0, 0, 1, 1], [], []>} : vector<8x128xbf16>, vector<128x128xbf16>, vector<8x128xf32> -> vector<8x128xf32>
      %c0_17 = arith.constant 0 : index
      %c0_18 = arith.constant 0 : index
      %21 = vector.load %arg7[%c0_17, %c0_18] : memref<1x128xf32, #tpu.memory_space<vmem>>, vector<1x128xf32>
      %22 = vector.broadcast %21 : vector<1x128xf32> to vector<8x128xf32>
      %23 = arith.addf %20, %22 : vector<8x128xf32>
      %cst_19 = arith.constant 0.000000e+00 : f32
      %24 = vector.broadcast %cst_19 : f32 to vector<8x128xf32>
      %25 = arith.cmpf ogt, %23, %24 : vector<8x128xf32>
      %cst_20 = arith.constant 2.000000e-01 : f32
      %26 = vector.broadcast %cst_20 : f32 to vector<8x128xf32>
      %27 = arith.mulf %26, %23 : vector<8x128xf32>
      %28 = arith.select %25, %23, %27 : vector<8x128xi1>, vector<8x128xf32>
      %29 = arith.truncf %28 : vector<8x128xf32> to vector<8x128xbf16>
      %c0_21 = arith.constant 0 : index
      %c0_22 = arith.constant 0 : index
      %30 = vector.load %arg8[%c0_21, %c0_22] : memref<128x128xbf16, #tpu.memory_space<vmem>>, vector<128x128xbf16>
      %cst_23 = arith.constant dense<0.000000e+00> : vector<8x128xf32>
      %31 = tpu.matmul %29, %30, %cst_23 {dimension_numbers = #tpu.dot_dimension_numbers<[1], [0], [0], [1], [0, 0, 1, 1], [], []>} : vector<8x128xbf16>, vector<128x128xbf16>, vector<8x128xf32> -> vector<8x128xf32>
      %c0_24 = arith.constant 0 : index
      %c0_25 = arith.constant 0 : index
      %32 = vector.load %arg9[%c0_24, %c0_25] : memref<1x128xf32, #tpu.memory_space<vmem>>, vector<1x128xf32>
      %33 = vector.broadcast %32 : vector<1x128xf32> to vector<8x128xf32>
      %34 = arith.addf %31, %33 : vector<8x128xf32>
      %cst_26 = arith.constant 0.000000e+00 : f32
      %35 = vector.broadcast %cst_26 : f32 to vector<8x128xf32>
      %36 = arith.cmpf ogt, %34, %35 : vector<8x128xf32>
      %cst_27 = arith.constant 2.000000e-01 : f32
      %37 = vector.broadcast %cst_27 : f32 to vector<8x128xf32>
      %38 = arith.mulf %37, %34 : vector<8x128xf32>
      %39 = arith.select %36, %34, %38 : vector<8x128xi1>, vector<8x128xf32>
      %40 = arith.truncf %39 : vector<8x128xf32> to vector<8x128xbf16>
      %c0_28 = arith.constant 0 : index
      %c0_29 = arith.constant 0 : index
      %41 = vector.load %arg10[%c0_28, %c0_29] : memref<128x128xbf16, #tpu.memory_space<vmem>>, vector<128x128xbf16>
      %cst_30 = arith.constant dense<0.000000e+00> : vector<8x128xf32>
      %42 = tpu.matmul %40, %41, %cst_30 {dimension_numbers = #tpu.dot_dimension_numbers<[1], [0], [0], [1], [0, 0, 1, 1], [], []>} : vector<8x128xbf16>, vector<128x128xbf16>, vector<8x128xf32> -> vector<8x128xf32>
      %c0_31 = arith.constant 0 : index
      %c0_32 = arith.constant 0 : index
      %43 = vector.load %arg11[%c0_31, %c0_32] : memref<1x128xf32, #tpu.memory_space<vmem>>, vector<1x128xf32>
      %44 = vector.broadcast %43 : vector<1x128xf32> to vector<8x128xf32>
      %45 = arith.addf %42, %44 : vector<8x128xf32>
      %c0_33 = arith.constant 0 : index
      %c0_34 = arith.constant 0 : index
      %46 = vector.load %arg12[%c0_33, %c0_34] : memref<8x128xf32, #tpu.memory_space<vmem>>, vector<8x128xf32>
      tpu.vector_store %arg12[%c0_33, %c0_34], %45 {strides = array<i32>} : memref<8x128xf32, #tpu.memory_space<vmem>>, vector<8x128xf32>,
    } else {
    }
    return
  }
  func.func @transform_0(%arg0: i32, %arg1: i32) -> (i32, i32) {
    %c0_i32 = arith.constant 0 : i32
    return %arg0, %arg1 : i32, i32
  }
  func.func @transform_1(%arg0: i32, %arg1: i32) -> (i32, i32) {
    %c0_i32 = arith.constant 0 : i32
    %c0_i32_0 = arith.constant 0 : i32
    return %arg1, %c0_i32 : i32, i32
  }
  func.func @transform_2(%arg0: i32, %arg1: i32) -> (i32, i32) {
    %c0_i32 = arith.constant 0 : i32
    %c0_i32_0 = arith.constant 0 : i32
    return %arg0, %c0_i32 : i32, i32
  }
  func.func @transform_3(%arg0: i32, %arg1: i32) -> (i32, i32) {
    %c0_i32 = arith.constant 0 : i32
    %c0_i32_0 = arith.constant 0 : i32
    %c0_i32_1 = arith.constant 0 : i32
    return %c0_i32, %c0_i32_0 : i32, i32
  }
  func.func @transform_4(%arg0: i32, %arg1: i32) -> (i32, i32) {
    %c0_i32 = arith.constant 0 : i32
    %c0_i32_0 = arith.constant 0 : i32
    %c0_i32_1 = arith.constant 0 : i32
    return %c0_i32, %c0_i32_0 : i32, i32
  }
  func.func @transform_5(%arg0: i32, %arg1: i32) -> (i32, i32) {
    %c0_i32 = arith.constant 0 : i32
    %c0_i32_0 = arith.constant 0 : i32
    %c0_i32_1 = arith.constant 0 : i32
    return %c0_i32, %c0_i32_0 : i32, i32
  }
  func.func @transform_6(%arg0: i32, %arg1: i32) -> (i32, i32) {
    %c0_i32 = arith.constant 0 : i32
    %c0_i32_0 = arith.constant 0 : i32
    %c0_i32_1 = arith.constant 0 : i32
    return %c0_i32, %c0_i32_0 : i32, i32
  }
  func.func @transform_7(%arg0: i32, %arg1: i32) -> (i32, i32) {
    %c0_i32 = arith.constant 0 : i32
    %c0_i32_0 = arith.constant 0 : i32
    %c0_i32_1 = arith.constant 0 : i32
    return %c0_i32, %c0_i32_0 : i32, i32
  }
  func.func @transform_8(%arg0: i32, %arg1: i32) -> (i32, i32) {
    %c0_i32 = arith.constant 0 : i32
    %c0_i32_0 = arith.constant 0 : i32
    %c0_i32_1 = arith.constant 0 : i32
    return %c0_i32, %c0_i32_0 : i32, i32
  }
  func.func @transform_9(%arg0: i32, %arg1: i32) -> (i32, i32) {
    %c0_i32 = arith.constant 0 : i32
    %c0_i32_0 = arith.constant 0 : i32
    %c0_i32_1 = arith.constant 0 : i32
    return %c0_i32, %c0_i32_0 : i32, i32
  }
  func.func @transform_10(%arg0: i32, %arg1: i32) -> (i32, i32) {
    %c0_i32 = arith.constant 0 : i32
    %c0_i32_0 = arith.constant 0 : i32
    return %arg0, %c0_i32 : i32, i32
  }
}

</mosaic_0001>

<bundles_post_ra>
// kernel: tpu_custom_call.1
= control target key start
LH: loop header
LB: loop body
LE: loop exit
PB: predicated region body
PF: predicated region fallthrough
CT: control target
= control target key end

     0   :  { %15 = vsyncpa [#allocation4], 0  ;;  %s1436_s0 = inlined_call_operand.hbm [shape: bf16[8,256], index: 0, kind: input, shape index: {}]   ;;  %s1437_s1 = inlined_call_operand.hbm [shape: bf16[256,128], index: 1, kind: input, shape index: {}]   ;;  %s1438_s2 = inlined_call_operand.hbm [shape: f32[8,128], index: 2, kind: input, shape index: {}]   ;;  %s1439_s3 = inlined_call_operand.hbm [shape: f32[1,128], index: 3, kind: input, shape index: {}]   ;;  %s1440_s4 = inlined_call_operand.hbm [shape: bf16[128,128], index: 4, kind: input, shape index: {}]   ;;  %s1441_s5 = inlined_call_operand.hbm [shape: f32[1,128], index: 5, kind: input, shape index: {}]   ;;  %s1442_s6 = inlined_call_operand.hbm [shape: bf16[128,128], index: 6, kind: input, shape index: {}]   ;;  %s1443_s7 = inlined_call_operand.hbm [shape: f32[1,128], index: 7, kind: input, shape index: {}]   ;;  %s1444_s8 = inlined_call_operand.hbm [shape: bf16[128,128], index: 8, kind: input, shape index: {}]   ;;  %s1445_s9 = inlined_call_operand.hbm [shape: f32[1,128], index: 9, kind: input, shape index: {}]   ;;  %s1446_s10 = inlined_call_operand.hbm [shape: f32[8,128], index: 10, kind: output, shape index: {}]  }
   0x1   :  { %16 = vsyncpa [#allocation7], 0 }
   0x2   :  { %17 = vsyncpa [#allocation10], 0 }
   0x3   :  { %18 = vsyncpa [#allocation13], 0 }
   0x4   :  { %19 = vsyncpa [#allocation16], 0 }
   0x5   :  { %20 = vsyncpa [#allocation19], 0 }
   0x6   :  { %21 = vsyncpa [#allocation5], 0  ;;  %s1192_s13 = smov [#allocation6]   ;;  %s936_s17 = scalar_lea.hbm %s1437_s1, 2048 }
   0x7   :  { %s37_s14 = sshll.u32 %s1192_s13, 4  ;;  %p937_p0 = scmp.ne.s32.totalorder %s1437_s1, %s936_s17  ;;  %s38_s14 = int_to_ptr.vmem [resolvable:$true] %s37_s14 }
   0x8   :  { %p940_p1 = scmp.lt.u32.totalorder %s936_s17, %s1437_s1 }
   0xa   :  { %p942_p2 = pnand %p940_p1, %p937_p0 }
   0xc   :  { %945 = shalt.err (!%p942_p2)
}
   0xd   :  { %s946_s22 = scalar_lea.vmem %s38_s14, 2048  ;;  %p951_p4 = scmp.lt.s32.totalorder %s38_s14, %s38_s14 }
   0xe   :  { %p947_p3 = scmp.ne.s32.totalorder %s38_s14, %s946_s22  ;;  %p952_p5 = scmp.lt.s32.totalorder %s946_s22, %s946_s22 }
  0x10   :  { %p953_p6 = por %p952_p5, %p951_p4 }
  0x12   :  { %p954_p7 = pnand %p953_p6, %p947_p3 }
  0x14   :  { %957 = shalt.err (!%p954_p7)
}
  0x15   :  { %s1193_s23 = smov 64   ;;  %s1194_s24 = smov 4  }
  0x16   :  { %43 = dma.hbm_to_vmem [thread:$0]  %s1437_s1, 2048, %s38_s14, [#allocation7], %s1193_s23, %s1193_s23, %s1194_s24  }
  0x17   :  { %s1195_s27 = smov [#allocation9]   ;;  %s1196_s29 = smov [#allocation12]  }
  0x18   :  { %s60_s28 = sshll.u32 %s1195_s27, 4  ;;  %s82_s30 = sshll.u32 %s1196_s29, 4  ;;  %s61_s28 = int_to_ptr.vmem [resolvable:$true] %s60_s28  ;;  %s83_s30 = int_to_ptr.vmem [resolvable:$true] %s82_s30 }
  0x19   :  { %s958_s13 = scalar_lea.hbm %s1439_s3, 16 }
  0x1a   :  { %p959_p8 = scmp.ne.s32.totalorder %s1439_s3, %s958_s13  ;;  %p962_p9 = scmp.lt.u32.totalorder %s958_s13, %s1439_s3 }
  0x1c   :  { %p964_p10 = pnand %p962_p9, %p959_p8 }
  0x1e   :  { %967 = shalt.err (!%p964_p10)
}
  0x1f   :  { %s968_s1 = scalar_lea.vmem %s61_s28, 16  ;;  %s972_s14 = scalar_lea.vmem %s61_s28, 32 }
  0x20   :  { %p969_p11 = scmp.ne.s32.totalorder %s61_s28, %s968_s1  ;;  %p973_p12 = scmp.lt.s32.totalorder %s61_s28, %s61_s28 }
  0x21   :  { %p974_p13 = scmp.lt.s32.totalorder %s972_s14, %s968_s1 }
  0x23   :  { %p975_p0 = por %p974_p13, %p973_p12 }
  0x25   :  { %p976_p1 = pnand %p975_p0, %p969_p11 }
  0x27   :  { %979 = shalt.err (!%p976_p1)
}
  0x28   :  { %63 = dma.hbm_to_vmem [thread:$0]  %s1439_s3, 16, %s61_s28, [#allocation10]  }
  0x29   :  { %s980_s25 = scalar_lea.hbm %s1441_s5, 16 }
  0x2a   :  { %p981_p2 = scmp.ne.s32.totalorder %s1441_s5, %s980_s25  ;;  %p984_p3 = scmp.lt.u32.totalorder %s980_s25, %s1441_s5 }
  0x2c   :  { %p986_p4 = pnand %p984_p3, %p981_p2 }
  0x2e   :  { %989 = shalt.err (!%p986_p4)
}
  0x2f   :  { %s990_s12 = scalar_lea.vmem %s83_s30, 16  ;;  %s994_s13 = scalar_lea.vmem %s83_s30, 32 }
  0x30   :  { %p991_p5 = scmp.ne.s32.totalorder %s83_s30, %s990_s12  ;;  %p995_p6 = scmp.lt.s32.totalorder %s83_s30, %s83_s30 }
  0x31   :  { %p996_p7 = scmp.lt.s32.totalorder %s994_s13, %s990_s12 }
  0x33   :  { %p997_p8 = por %p996_p7, %p995_p6 }
  0x35   :  { %p998_p9 = pnand %p997_p8, %p991_p5 }
  0x37   :  { %1001 = shalt.err (!%p998_p9)
}
  0x38   :  { %85 = dma.hbm_to_vmem [thread:$0]  %s1441_s5, 16, %s83_s30, [#allocation13]  }
  0x39   :  { %s1197_s15 = smov [#allocation15]   ;;  %s1198_s17 = smov [#allocation3]  }
  0x3a   :  { %s104_s16 = sshll.u32 %s1197_s15, 4  ;;  %s28_s18 = sshll.u32 %s1198_s17, 4  ;;  %s105_s16 = int_to_ptr.vmem [resolvable:$true] %s104_s16  ;;  %s29_s18 = int_to_ptr.vmem [resolvable:$true] %s28_s18 }
  0x3b   :  { %s1002_s19 = scalar_lea.hbm %s1443_s7, 16 }
  0x3c   :  { %p1003_p10 = scmp.ne.s32.totalorder %s1443_s7, %s1002_s19  ;;  %p1006_p11 = scmp.lt.u32.totalorder %s1002_s19, %s1443_s7 }
  0x3e   :  { %p1008_p12 = pnand %p1006_p11, %p1003_p10 }
  0x40   :  { %1011 = shalt.err (!%p1008_p12)
}
  0x41   :  { %s1012_s5 = scalar_lea.vmem %s105_s16, 16  ;;  %s1016_s30 = scalar_lea.vmem %s105_s16, 32 }
  0x42   :  { %p1013_p13 = scmp.ne.s32.totalorder %s105_s16, %s1012_s5  ;;  %p1017_p0 = scmp.lt.s32.totalorder %s105_s16, %s105_s16 }
  0x43   :  { %p1018_p1 = scmp.lt.s32.totalorder %s1016_s30, %s1012_s5 }
  0x45   :  { %p1019_p2 = por %p1018_p1, %p1017_p0 }
  0x47   :  { %p1020_p3 = pnand %p1019_p2, %p1013_p13 }
  0x49   :  { %1023 = shalt.err (!%p1020_p3)
}
  0x4a   :  { %107 = dma.hbm_to_vmem [thread:$0]  %s1443_s7, 16, %s105_s16, [#allocation16]  }
  0x4b   :  { %s1024_s12 = scalar_lea.hbm %s1436_s0, 128 }
  0x4c   :  { %p1025_p4 = scmp.ne.s32.totalorder %s1436_s0, %s1024_s12  ;;  %p1028_p5 = scmp.lt.u32.totalorder %s1024_s12, %s1436_s0 }
  0x4e   :  { %p1030_p6 = pnand %p1028_p5, %p1025_p4 }
  0x50   :  { %1033 = shalt.err (!%p1030_p6)
}
  0x51   :  { %s1034_s17 = scalar_lea.vmem %s29_s18, 128  ;;  %p1039_p8 = scmp.lt.s32.totalorder %s29_s18, %s29_s18 }
  0x52   :  { %p1035_p7 = scmp.ne.s32.totalorder %s29_s18, %s1034_s17  ;;  %p1040_p9 = scmp.lt.s32.totalorder %s1034_s17, %s1034_s17 }
  0x54   :  { %p1041_p10 = por %p1040_p9, %p1039_p8 }
  0x56   :  { %p1042_p11 = pnand %p1041_p10, %p1035_p7 }
  0x58   :  { %1045 = shalt.err (!%p1042_p11)
}
  0x59   :  { %31 = dma.hbm_to_vmem [thread:$0]  %s1436_s0, 128, %s29_s18, [#allocation4]  }
  0x5a   :  { %s1199_s1 = smov [#allocation8]   ;;  %s1200_s19 = smov [#allocation11]  }
  0x5b   :  { %s50_s14 = sshll.u32 %s1199_s1, 4  ;;  %s69_s20 = sshll.u32 %s1200_s19, 4  ;;  %s51_s14 = int_to_ptr.vmem [resolvable:$true] %s50_s14  ;;  %s70_s20 = int_to_ptr.vmem [resolvable:$true] %s69_s20 }
  0x5c   :  { %s1046_s25 = scalar_lea.hbm %s1438_s2, 128 }
  0x5d   :  { %p1047_p12 = scmp.ne.s32.totalorder %s1438_s2, %s1046_s25  ;;  %p1050_p13 = scmp.lt.u32.totalorder %s1046_s25, %s1438_s2 }
  0x5f   :  { %p1052_p0 = pnand %p1050_p13, %p1047_p12 }
  0x61   :  { %1055 = shalt.err (!%p1052_p0)
}
  0x62   :  { %s1056_s0 = scalar_lea.vmem %s51_s14, 128  ;;  %p1061_p2 = scmp.lt.s32.totalorder %s51_s14, %s51_s14 }
  0x63   :  { %p1057_p1 = scmp.ne.s32.totalorder %s51_s14, %s1056_s0  ;;  %p1062_p3 = scmp.lt.s32.totalorder %s1056_s0, %s1056_s0 }
  0x65   :  { %p1063_p4 = por %p1062_p3, %p1061_p2 }
  0x67   :  { %p1064_p5 = pnand %p1063_p4, %p1057_p1 }
  0x69   :  { %1067 = shalt.err (!%p1064_p5)
}
  0x6a   :  { %53 = dma.hbm_to_vmem [thread:$0]  %s1438_s2, 128, %s51_s14, [#allocation7]  }
  0x6b   :  { %s1068_s13 = scalar_lea.hbm %s1440_s4, 1024 }
  0x6c   :  { %p1069_p6 = scmp.ne.s32.totalorder %s1440_s4, %s1068_s13  ;;  %p1072_p7 = scmp.lt.u32.totalorder %s1068_s13, %s1440_s4 }
  0x6e   :  { %p1074_p8 = pnand %p1072_p7, %p1069_p6 }
  0x70   :  { %1077 = shalt.err (!%p1074_p8)
}
  0x71   :  { %s1078_s7 = scalar_lea.vmem %s70_s20, 1024  ;;  %p1083_p10 = scmp.lt.s32.totalorder %s70_s20, %s70_s20 }
  0x72   :  { %p1079_p9 = scmp.ne.s32.totalorder %s70_s20, %s1078_s7  ;;  %p1084_p11 = scmp.lt.s32.totalorder %s1078_s7, %s1078_s7 }
  0x74   :  { %p1085_p12 = por %p1084_p11, %p1083_p10 }
  0x76   :  { %p1086_p13 = pnand %p1085_p12, %p1079_p9 }
  0x78   :  { %1089 = shalt.err (!%p1086_p13)
}
  0x79   :  { %75 = dma.hbm_to_vmem [thread:$0]  %s1440_s4, 1024, %s70_s20, [#allocation10], %s1193_s23, %s1193_s23, %s1194_s24  }
  0x7a   :  { %s1201_s1 = smov [#allocation14]   ;;  %s1202_s19 = smov [#allocation17]  }
  0x7b   :  { %s91_s14 = sshll.u32 %s1201_s1, 4  ;;  %s113_s21 = sshll.u32 %s1202_s19, 4  ;;  %s92_s14 = int_to_ptr.vmem [resolvable:$true] %s91_s14  ;;  %s114_s21 = int_to_ptr.vmem [resolvable:$true] %s113_s21 }
  0x7c   :  { %s1090_s5 = scalar_lea.hbm %s1442_s6, 1024 }
  0x7d   :  { %p1091_p0 = scmp.ne.s32.totalorder %s1442_s6, %s1090_s5  ;;  %p1094_p1 = scmp.lt.u32.totalorder %s1090_s5, %s1442_s6 }
  0x7f   :  { %p1096_p2 = pnand %p1094_p1, %p1091_p0 }
  0x81   :  { %1099 = shalt.err (!%p1096_p2)
}
  0x82   :  { %s1100_s4 = scalar_lea.vmem %s92_s14, 1024  ;;  %p1105_p4 = scmp.lt.s32.totalorder %s92_s14, %s92_s14 }
  0x83   :  { %p1101_p3 = scmp.ne.s32.totalorder %s92_s14, %s1100_s4  ;;  %p1106_p5 = scmp.lt.s32.totalorder %s1100_s4, %s1100_s4 }
  0x85   :  { %p1107_p6 = por %p1106_p5, %p1105_p4 }
  0x87   :  { %p1108_p7 = pnand %p1107_p6, %p1101_p3 }
  0x89   :  { %1111 = shalt.err (!%p1108_p7)
}
  0x8a   :  { %97 = dma.hbm_to_vmem [thread:$0]  %s1442_s6, 1024, %s92_s14, [#allocation13], %s1193_s23, %s1193_s23, %s1194_s24  }
  0x8b   :  { %s1112_s12 = scalar_lea.hbm %s1444_s8, 1024 }
  0x8c   :  { %p1113_p8 = scmp.ne.s32.totalorder %s1444_s8, %s1112_s12  ;;  %p1116_p9 = scmp.lt.u32.totalorder %s1112_s12, %s1444_s8 }
  0x8e   :  { %p1118_p10 = pnand %p1116_p9, %p1113_p8 }
  0x90   :  { %1121 = shalt.err (!%p1118_p10)
}
  0x91   :  { %s1122_s17 = scalar_lea.vmem %s114_s21, 1024  ;;  %p1127_p12 = scmp.lt.s32.totalorder %s114_s21, %s114_s21 }
  0x92   :  { %p1123_p11 = scmp.ne.s32.totalorder %s114_s21, %s1122_s17  ;;  %p1128_p13 = scmp.lt.s32.totalorder %s1122_s17, %s1122_s17 }
  0x94   :  { %p1129_p0 = por %p1128_p13, %p1127_p12 }
  0x96   :  { %p1130_p1 = pnand %p1129_p0, %p1123_p11 }
  0x98   :  { %1133 = shalt.err (!%p1130_p1)
}
  0x99   :  { %119 = dma.hbm_to_vmem [thread:$0]  %s1444_s8, 1024, %s114_s21, [#allocation16], %s1193_s23, %s1193_s23, %s1194_s24  }
  0x9a   :  { %s1203_s2 = smov [#allocation18]   ;;  %s1134_s19 = scalar_lea.hbm %s1445_s9, 16 }
  0x9b   :  { %s126_s16 = sshll.u32 %s1203_s2, 4  ;;  %p1135_p2 = scmp.ne.s32.totalorder %s1445_s9, %s1134_s19  ;;  %s127_s16 = int_to_ptr.vmem [resolvable:$true] %s126_s16 }
  0x9c   :  { %p1138_p3 = scmp.lt.u32.totalorder %s1134_s19, %s1445_s9 }
  0x9e   :  { %p1140_p4 = pnand %p1138_p3, %p1135_p2 }
  0xa0   :  { %1143 = shalt.err (!%p1140_p4)
}
  0xa1   :  { %s1144_s26 = scalar_lea.vmem %s127_s16, 16  ;;  %s1148_s8 = scalar_lea.vmem %s127_s16, 32 }
  0xa2   :  { %p1145_p5 = scmp.ne.s32.totalorder %s127_s16, %s1144_s26  ;;  %p1149_p6 = scmp.lt.s32.totalorder %s127_s16, %s127_s16 }
  0xa3   :  { %p1150_p7 = scmp.lt.s32.totalorder %s1148_s8, %s1144_s26 }
  0xa5   :  { %p1151_p8 = por %p1150_p7, %p1149_p6 }
  0xa7   :  { %p1152_p9 = pnand %p1151_p8, %p1145_p5 }
  0xa9   :  { %1155 = shalt.err (!%p1152_p9)
}
  0xaa   :  { %129 = dma.hbm_to_vmem [thread:$0]  %s1445_s9, 16, %s127_s16, [#allocation19]  }
  0xab   :  { %1178 = dma.done.wait [#allocation4], 128  }
  0xac   :  { %1179 = vsyncadd [#allocation4], 4294967168 }
  0xad   :  { %1180 = dma.done.wait [#allocation7], 2176  }
  0xae   :  { %1181 = vsyncadd [#allocation7], 4294965120 }
  0xaf   :  { %1182 = dma.done.wait [#allocation10], 1040  }
  0xb0   :  { %1183 = vsyncadd [#allocation10], 4294966256 }
  0xb1   :  { %1184 = dma.done.wait [#allocation13], 1040  }
  0xb2   :  { %1185 = vsyncadd [#allocation13], 4294966256 }
  0xb3   :  { %1186 = dma.done.wait [#allocation16], 1040  }
  0xb4   :  { %1187 = vsyncadd [#allocation16], 4294966256 }
  0xb5   :  { %1188 = dma.done.wait [#allocation19], 16  }
  0xb6   :  { %1189 = vsyncadd [#allocation19], 4294967280  ;;  %v1204_v0 = vmov 0.0   ;;  %v894_v1 = vld [vmem:[#allocation6 + $0x40] sm:$0xff]   ;;  %v896_v3 = vld [vmem:[#allocation6 + $0x48] sm:$0xff]   ;;  %vm1205_vm0 = vmmov 0  }
  0xb7   :  { %819 = vmatprep.subr.bf16.mxu1 %v1204_v0  ;;  %v895_v2 = vld [vmem:[#allocation6] sm:$0xff]   ;;  %770 = vmatprep.subr.bf16.mxu0 %v894_v1  ;;  %v897_v4 = vld [vmem:[#allocation6 + $0x8] sm:$0xff]   ;;  %v898_v5 = vld [vmem:[#allocation6 + $0x50] sm:$0xff]   ;;  %s1206_s9 = smov [#allocation20]  }
  0xb8   :  { %771 = vmatpush3.bf16.msra.mxu0 %v895_v2  ;;  %v899_v6 = vld [vmem:[#allocation6 + $0x10] sm:$0xff]   ;;  %v900_v7 = vld [vmem:[#allocation6 + $0x58] sm:$0xff]   ;;  %v902_v9 = vld [vmem:[#allocation6 + $0x60] sm:$0xff]   ;;  %835 = vmatprep.mubr.msk.bf16.mxu1 %vm1205_vm0, %v1204_v0  ;;  %s710_s21 = sshll.u32 %s1206_s9, 4  ;;  %s711_s21 = int_to_ptr.vmem [resolvable:$true] %s710_s21 }
  0xb9   :  { %772 = vmatprep.subr.bf16.mxu0 %v896_v3  ;;  %v901_v8 = vld [vmem:[#allocation6 + $0x18] sm:$0xff]   ;;  %v903_v10 = vld [vmem:[#allocation6 + $0x20] sm:$0xff]   ;;  %v904_v11 = vld [vmem:[#allocation6 + $0x68] sm:$0xff]   ;;  %s1156_s27 = scalar_lea.vmem %s711_s21, 128  ;;  %p1161_p11 = scmp.lt.s32.totalorder %s711_s21, %s711_s21 }
  0xba   :  { %v176_v12 = vld [vmem:[#allocation3] sm:$0xff]  ;;  %v912_v14 = vld [vmem:[#allocation11] sm:$0xff]   ;;  %v915_v22 = vld [vmem:[#allocation11 + $0x18] sm:$0xff]   ;;  %p1157_p10 = scmp.ne.s32.totalorder %s711_s21, %s1156_s27  ;;  %p1162_p12 = scmp.lt.s32.totalorder %s1156_s27, %s1156_s27 }
  0xbb   :  { %v726_v13 = vcombine.high %v176_v12, %v176_v12  ;;  %v905_v15 = vld [vmem:[#allocation6 + $0x28] sm:$0xff]   ;;  %v906_v16 = vld [vmem:[#allocation6 + $0x70] sm:$0xff]   ;;  %820 = vmatpush3.bf16.msra.mxu1 %v912_v14  ;;  %v908_v19 = vld [vmem:[#allocation6 + $0x78] sm:$0xff]   ;;  %v725_v23 = vcombine.low %v176_v12, %v176_v12 }
  0xbc   :  { %773 = vmatpush3.bf16.msra.mxu0 %v897_v4  ;;  %v913_v17 = vld [vmem:[#allocation11 + $0x8] sm:$0xff]   ;;  %821 = vmatprep.subr.bf16.mxu1 %v1204_v0  ;;  %v914_v20 = vld [vmem:[#allocation11 + $0x10] sm:$0xff]   ;;  %v916_v24 = vld [vmem:[#allocation11 + $0x20] sm:$0xff]   ;;  %p1163_p13 = por %p1162_p12, %p1161_p11 }
  0xbd   :  { %774 = vmatprep.subr.bf16.mxu0 %v898_v5  ;;  %344 = vmatprep.mubr.bf16.mxu0 %v726_v13  ;;  %v907_v18 = vld [vmem:[#allocation6 + $0x30] sm:$0xff]   ;;  %v909_v21 = vld [vmem:[#allocation6 + $0x38] sm:$0xff]   ;;  %v919_v27 = vld [vmem:[#allocation11 + $0x38] sm:$0xff]  }
  0xbe   :  { %v917_v25 = vld [vmem:[#allocation11 + $0x28] sm:$0xff]   ;;  %v918_v26 = vld [vmem:[#allocation11 + $0x30] sm:$0xff]   ;;  %v923_v31 = vld [vmem:[#allocation14 + $0x18] sm:$0xff]   ;;  %p1164_p0 = pnand %p1163_p13, %p1157_p10 }
  0xbf   :  { %822 = vmatpush3.bf16.msra.mxu1 %v913_v17  ;;  %v920_v28 = vld [vmem:[#allocation14] sm:$0xff]   ;;  %v921_v29 = vld [vmem:[#allocation14 + $0x8] sm:$0xff]   ;;  %v922_v30 = vld [vmem:[#allocation14 + $0x10] sm:$0xff]  }
  0xc0   :  { %775 = vmatpush3.bf16.msra.mxu0 %v899_v6  ;;  %823 = vmatprep.subr.bf16.mxu1 %v1204_v0  ;;  %v924_v32 = vld [vmem:[#allocation14 + $0x20] sm:$0xff]   ;;  %v925_v33 = vld [vmem:[#allocation14 + $0x28] sm:$0xff]   ;;  %v165_v34 = vld [vmem:[#allocation8] sm:$0xff] }
  0xc1   :  { %776 = vmatprep.subr.bf16.mxu0 %v900_v7  ;;  %v724_v35 = vld [vmem:[#allocation9] ss:$0 sm:$0xff]  ;;  %v926_v46 = vld [vmem:[#allocation14 + $0x30] sm:$0xff]   ;;  %v928_v48 = vld [vmem:[#allocation17] sm:$0xff]  }
  0xc2   :  { %v173_v37 = vadd.f32 %v724_v35, %v165_v34  ;;  %v927_v47 = vld [vmem:[#allocation14 + $0x38] sm:$0xff]   ;;  %v929_v49 = vld [vmem:[#allocation17 + $0x8] sm:$0xff]   ;;  %v932_v52 = vld [vmem:[#allocation17 + $0x20] sm:$0xff]  }
  0xc3   :  { %824 = vmatpush3.bf16.msra.mxu1 %v914_v20  ;;  %v930_v50 = vld [vmem:[#allocation17 + $0x10] sm:$0xff]   ;;  %v931_v51 = vld [vmem:[#allocation17 + $0x18] sm:$0xff]   ;;  %v933_v53 = vld [vmem:[#allocation17 + $0x28] sm:$0xff]  }
  0xc4   :  { %777 = vmatpush3.bf16.msra.mxu0 %v901_v8  ;;  %825 = vmatprep.subr.bf16.mxu1 %v1204_v0  ;;  %v743_v54 = vld [vmem:[#allocation12] ss:$0 sm:$0xff]  ;;  %v934_v63 = vld [vmem:[#allocation17 + $0x30] sm:$0xff]   ;;  %v752_v2 = vld [vmem:[#allocation15] ss:$0 sm:$0xff] }
  0xc5   :  { %778 = vmatprep.subr.bf16.mxu0 %v902_v9  ;;  %v935_v1 = vld [vmem:[#allocation17 + $0x38] sm:$0xff]  }
  0xc7   :  { %826 = vmatpush3.bf16.msra.mxu1 %v915_v22 }
  0xc8   :  { %779 = vmatpush3.bf16.msra.mxu0 %v903_v10  ;;  %827 = vmatprep.subr.bf16.mxu1 %v1204_v0 }
  0xc9   :  { %780 = vmatprep.subr.bf16.mxu0 %v904_v11  ;;  %v761_v11 = vld [vmem:[#allocation18] ss:$0 sm:$0xff] }
  0xcb   :  { %828 = vmatpush3.bf16.msra.mxu1 %v916_v24 }
  0xcc   :  { %781 = vmatpush3.bf16.msra.mxu0 %v905_v15  ;;  %829 = vmatprep.subr.bf16.mxu1 %v1204_v0 }
  0xcd   :  { %782 = vmatprep.subr.bf16.mxu0 %v906_v16 }
  0xcf   :  { %830 = vmatpush3.bf16.msra.mxu1 %v917_v25 }
  0xd0   :  { %783 = vmatpush3.bf16.msra.mxu0 %v907_v18  ;;  %831 = vmatprep.subr.bf16.mxu1 %v1204_v0 }
  0xd1   :  { %784 = vmatprep.subr.bf16.mxu0 %v908_v19 }
  0xd3   :  { %832 = vmatpush3.bf16.msra.mxu1 %v918_v26 }
  0xd4   :  { %785 = vmatpush3.bf16.msra.mxu0 %v909_v21  ;;  %833 = vmatprep.subr.bf16.mxu1 %v1204_v0 }
  0xd5   :  { %839 = vmatprep.subr.bf16.mxu0 %v1204_v0 }
  0xd7   :  { %345 = vmatmul.mubr.bf16.vlgmr.msra.gmra.mrb[0].mxu0 %v725_v23  ;;  %834 = vmatpush3.bf16.msra.mxu1 %v919_v27 }
  0xd8   :  { %855 = vmatprep.mubr.msk.bf16.mxu0 %vm1205_vm0, %v1204_v0  ;;  %859 = vmatprep.subr.bf16.mxu1 %v1204_v0 }
  0xd9   :  { %840 = vmatpush3.bf16.msra.mxu0 %v920_v28 }
  0xda   :  { %841 = vmatprep.subr.bf16.mxu0 %v1204_v0 }
  0xdd   :  { %842 = vmatpush3.bf16.msra.mxu0 %v921_v29 }
  0xde   :  { %843 = vmatprep.subr.bf16.mxu0 %v1204_v0 }
  0xe1   :  { %844 = vmatpush3.bf16.msra.mxu0 %v922_v30 }
  0xe2   :  { %845 = vmatprep.subr.bf16.mxu0 %v1204_v0 }
  0xe5   :  { %846 = vmatpush3.bf16.msra.mxu0 %v923_v31 }
  0xe6   :  { %847 = vmatprep.subr.bf16.mxu0 %v1204_v0 }
  0xe9   :  { %848 = vmatpush3.bf16.msra.mxu0 %v924_v32 }
  0xea   :  { %849 = vmatprep.subr.bf16.mxu0 %v1204_v0 }
  0xed   :  { %850 = vmatpush3.bf16.msra.mxu0 %v925_v33 }
  0xee   :  { %851 = vmatprep.subr.bf16.mxu0 %v1204_v0 }
  0xf1   :  { %852 = vmatpush3.bf16.msra.mxu0 %v926_v46 }
  0xf2   :  { %853 = vmatprep.subr.bf16.mxu0 %v1204_v0 }
  0xf5   :  { %854 = vmatpush3.bf16.msra.mxu0 %v927_v47 }
 0x1aa   :  { %v786_v36 = vpop.f32.mrb[0].mxu0 }
 0x1ab   :  { %v787_v38 = vpop.f32.mrb[1].mxu0 }
 0x1ac   :  { %v788_v39 = vadd.f32 %v787_v38, %v786_v36  ;;  %v789_v40 = vpop.f32.mrb[2].mxu0 }
 0x1ad   :  { %v790_v41 = vpop.f32.mrb[3].mxu0 }
 0x1ae   :  { %v352_v42 = vadd.f32 %v788_v39, %v173_v37 }
 0x1b0   :  { %v359_v43 = vmul.f32 0.2, %v352_v42  ;;  %vm358_vm1 = vcmp.gt.f32.partialorder %v352_v42, 0.0 }
 0x1b2   :  { %v360_v44 = vsel %vm358_vm1, %v352_v42, %v359_v43 }
 0x1b3   :  { %v361_v45 = vpack.c.bf16 %v360_v44, %v360_v44 }
 0x1b5   :  { %836 = vmatmul.mubr.bf16.vlgmr.msra.gmra.mrb[0].mxu1 %v361_v45 }
 0x1b6   :  { %875 = vmatprep.mubr.msk.bf16.mxu1 %vm1205_vm0, %v1204_v0  ;;  %860 = vmatpush3.bf16.msra.mxu1 %v928_v48 }
 0x1b7   :  { %861 = vmatprep.subr.bf16.mxu1 %v1204_v0 }
 0x1ba   :  { %862 = vmatpush3.bf16.msra.mxu1 %v929_v49 }
 0x1bb   :  { %863 = vmatprep.subr.bf16.mxu1 %v1204_v0 }
 0x1be   :  { %864 = vmatpush3.bf16.msra.mxu1 %v930_v50 }
 0x1bf   :  { %865 = vmatprep.subr.bf16.mxu1 %v1204_v0 }
 0x1c2   :  { %866 = vmatpush3.bf16.msra.mxu1 %v931_v51 }
 0x1c3   :  { %867 = vmatprep.subr.bf16.mxu1 %v1204_v0 }
 0x1c6   :  { %868 = vmatpush3.bf16.msra.mxu1 %v932_v52 }
 0x1c7   :  { %869 = vmatprep.subr.bf16.mxu1 %v1204_v0 }
 0x1ca   :  { %870 = vmatpush3.bf16.msra.mxu1 %v933_v53 }
 0x1cb   :  { %871 = vmatprep.subr.bf16.mxu1 %v1204_v0 }
 0x1ce   :  { %872 = vmatpush3.bf16.msra.mxu1 %v934_v63 }
 0x1cf   :  { %873 = vmatprep.subr.bf16.mxu1 %v1204_v0 }
 0x1d2   :  { %874 = vmatpush3.bf16.msra.mxu1 %v935_v1 }
 0x288   :  { %v467_v55 = vpop.f32.mrb[0].mxu1 }
 0x289   :  { %v468_v56 = vadd.f32 %v743_v54, %v467_v55  ;;  %v837_v57 = vpop.f32.mrb[1].mxu1 }
 0x28a   :  { %v470_v58 = vpop.f32.mrb[2].mxu1 }
 0x28b   :  { %vm473_vm2 = vcmp.gt.f32.partialorder %v468_v56, 0.0  ;;  %v474_v59 = vmul.f32 0.2, %v468_v56  ;;  %v838_v60 = vpop.f32.mrb[3].mxu1 }
 0x28d   :  { %v475_v61 = vsel %vm473_vm2, %v468_v56, %v474_v59 }
 0x28e   :  { %v476_v62 = vpack.c.bf16 %v475_v61, %v475_v61 }
 0x290   :  { %856 = vmatmul.mubr.bf16.vlgmr.msra.gmra.mrb[4].mxu0 %v476_v62 }
 0x363   :  { %v582_v3 = vpop.f32.mrb[4].mxu0 }
 0x364   :  { %v583_v4 = vadd.f32 %v752_v2, %v582_v3  ;;  %v857_v5 = vpop.f32.mrb[5].mxu0 }
 0x365   :  { %v585_v6 = vpop.f32.mrb[6].mxu0 }
 0x366   :  { %vm588_vm3 = vcmp.gt.f32.partialorder %v583_v4, 0.0  ;;  %v589_v7 = vmul.f32 0.2, %v583_v4  ;;  %v858_v8 = vpop.f32.mrb[7].mxu0 }
 0x368   :  { %v590_v9 = vsel %vm588_vm3, %v583_v4, %v589_v7 }
 0x369   :  { %v591_v10 = vpack.c.bf16 %v590_v9, %v590_v9 }
 0x36b   :  { %876 = vmatmul.mubr.bf16.vlgmr.msra.gmra.mrb[4].mxu1 %v591_v10 }
 0x43e   :  { %v697_v12 = vpop.f32.mrb[4].mxu1 }
 0x43f   :  { %v698_v13 = vadd.f32 %v761_v11, %v697_v12  ;;  %v877_v14 = vpop.f32.mrb[5].mxu1 }
 0x440   :  { %v700_v0 = vpop.f32.mrb[6].mxu1 }
 0x441   :  { %703 = vst [vmem:[#allocation20] sm:$0xff] %v698_v13  ;;  %v878_v15 = vpop.f32.mrb[7].mxu1 }
 0x442   :  { %1167 = shalt.err (!%p1164_p0)
}
 0x443   :  { %s1168_s20 = scalar_lea.hbm %s1446_s10, 128 }
 0x444   :  { %p1169_p1 = scmp.ne.s32.totalorder %s1446_s10, %s1168_s20  ;;  %p1172_p2 = scmp.lt.u32.totalorder %s1168_s20, %s1446_s10 }
 0x446   :  { %p1174_p3 = pnand %p1172_p2, %p1169_p1 }
 0x448   :  { %1177 = shalt.err (!%p1174_p3)
}
 0x449   :  { %713 = dma.vmem_to_hbm [thread:$0]  %s711_s21, 128, %s1446_s10, [#allocation5]  }
 0x44a   :  { %1190 = dma.done.wait [#allocation5], 128  }
 0x44b   :  { %1191 = vsyncadd [#allocation5], 4294967168 }
 0x44c   :  { %717 = vsyncpa [#allocation4], 1 }
 0x44d   :  { %718 = vsyncpa [#allocation7], 1 }
 0x44e   :  { %719 = vsyncpa [#allocation10], 1 }
 0x44f   :  { %720 = vsyncpa [#allocation13], 1 }
 0x450   :  { %721 = vsyncpa [#allocation16], 1 }
 0x451   :  { %722 = vsyncpa [#allocation19], 1 }
 0x452   :  { %723 = vsyncpa [#allocation5], 1 }

</bundles_post_ra>
